<compile_context>
chip_gen: v7x
topology: tpu7x:2x2x1
jax: 0.10.0
libtpu: 0.0.40
codegen_flags: <defaults>
</compile_context>

<pallas_src>
import jax
import jax.numpy as jnp
from jax.experimental import pallas as pl
from jax.experimental.pallas import tpu as pltpu


HIDDEN = 128


def _round_up(x, m):
    return (x + m - 1) // m * m


# ----------------------------------------------------------------------------
# Kernel: fused  Linear -> ReLU -> Linear -> ReLU -> Linear -> ReLU
# ----------------------------------------------------------------------------
def _mlp_kernel(x_ref, w1_ref, b1_ref, w2_ref, b2_ref, w3_ref, b3_ref, o_ref):
    x = x_ref[...]

    h1 = jnp.dot(x, w1_ref[...], preferred_element_type=jnp.float32) + b1_ref[...]
    h1 = jnp.maximum(h1, 0.0)

    h2 = jnp.dot(h1.astype(w2_ref.dtype), w2_ref[...],
                 preferred_element_type=jnp.float32) + b2_ref[...]
    h2 = jnp.maximum(h2, 0.0)

    h3 = jnp.dot(h2.astype(w3_ref.dtype), w3_ref[...],
                 preferred_element_type=jnp.float32) + b3_ref[...]
    h3 = jnp.maximum(h3, 0.0)

    o_ref[...] = h3.astype(o_ref.dtype)


def _choose_tm(B, tm_max):
    """Row-tile selection.

    - Large fused batch: big tile (amortizes per-grid-step pipeline overhead).
    - Moderate batch: force >=2 grid steps so v7x's second TensorCore (grid
      axis is "parallel") is used; harmless on single-TC v5e/v6e.
    - Tiny batch: single sublane-aligned tile.
    """
    if B >= 2 * tm_max:
        return tm_max
    if B >= 64:
        return min(tm_max, _round_up((B + 1) // 2, 8))
    return _round_up(max(B, 1), 8)


def mlp_fused_forward(pieces, params, *, tm_max=1024, compute_dtype=None):
    """Apply the shared 3-layer MLP to the row-wise concatenation of `pieces`
    (each (b_i, in_size)) in ONE pallas_call. Returns the (possibly row-padded)
    output; callers slice the rows they need."""
    in_size = pieces[0].shape[1]
    out_dtype = pieces[0].dtype
    B = sum(int(p.shape[0]) for p in pieces)

    tm = _choose_tm(B, tm_max)
    rows = _round_up(B, tm)

    # Fold row padding into the single concatenate (no full-array jnp.pad).
    pieces = list(pieces)
    if rows != B:
        pieces.append(jnp.zeros((rows - B, in_size), out_dtype))
    x = pieces[0] if len(pieces) == 1 else jnp.concatenate(pieces, axis=0)

    w1, b1, w2, b2, w3, b3 = params
    hidden = w1.shape[1]

    # bf16 operands (f32 accumulation) once the fused batch is large enough to
    # be compute-bound; biases stay f32 (VPU add).
    if compute_dtype is None:
        compute_dtype = jnp.bfloat16 if rows >= 1024 else jnp.float32
    if x.dtype != compute_dtype:
        x = x.astype(compute_dtype)
    if w1.dtype != compute_dtype:
        w1 = w1.astype(compute_dtype)
        w2 = w2.astype(compute_dtype)
        w3 = w3.astype(compute_dtype)

    grid = (rows // tm,)
    full = lambda i: (0, 0)  # weights / biases: one constant block, fetched once

    op_itemsize = jnp.dtype(compute_dtype).itemsize
    flops = 2 * rows * (in_size * hidden + hidden * hidden + hidden * in_size)
    bytes_accessed = (
        rows * in_size * op_itemsize                              # x read
        + rows * in_size * jnp.dtype(out_dtype).itemsize          # out write
        + sum(int(p.size) * jnp.dtype(p.dtype).itemsize
              for p in (w1, b1, w2, b2, w3, b3))
    )

    out = pl.pallas_call(
        _mlp_kernel,
        out_shape=jax.ShapeDtypeStruct((rows, in_size), out_dtype),
        grid_spec=pltpu.PrefetchScalarGridSpec(
            num_scalar_prefetch=0,
            grid=grid,
            in_specs=[
                pl.BlockSpec((tm, in_size), lambda i: (i, 0)),    # x rows
                pl.BlockSpec((in_size, hidden), full),            # W1
                pl.BlockSpec((1, hidden), full),                  # b1
                pl.BlockSpec((hidden, hidden), full),             # W2
                pl.BlockSpec((1, hidden), full),                  # b2
                pl.BlockSpec((hidden, in_size), full),            # W3
                pl.BlockSpec((1, in_size), full),                 # b3
            ],
            out_specs=pl.BlockSpec((tm, in_size), lambda i: (i, 0)),
        ),
        compiler_params=pltpu.CompilerParams(
            dimension_semantics=("parallel",),
        ),
        cost_estimate=pl.CostEstimate(
            flops=flops, transcendentals=0, bytes_accessed=bytes_accessed),
    )(x, w1, b1, w2, b2, w3, b3)

    return out


# ----------------------------------------------------------------------------
# Module wrapper (mirrors Vector_convert.forward) — single fused launch
# ----------------------------------------------------------------------------
def init_vector_convert_params(key, in_size, hidden=HIDDEN, dtype=jnp.float32):
    """Deterministic init mimicking nn.Linear's U(-1/sqrt(fan_in), 1/sqrt(fan_in))."""
    ks = jax.random.split(key, 6)

    def lin(kw, kb, fan_in, fan_out):
        bound = 1.0 / jnp.sqrt(jnp.float32(fan_in))
        w = jax.random.uniform(kw, (fan_in, fan_out), dtype, -bound, bound)
        b = jax.random.uniform(kb, (1, fan_out), dtype, -bound, bound)
        return w, b

    w1, b1 = lin(ks[0], ks[1], in_size, hidden)
    w2, b2 = lin(ks[2], ks[3], hidden, hidden)
    w3, b3 = lin(ks[4], ks[5], hidden, in_size)
    return (w1, b1, w2, b2, w3, b3)


def vector_convert_forward(params, datasets, vector1, vector2):
    """content[d] = MLP(vector1[d]); domain[d] = MLP(vector2[d]) — one kernel launch."""
    order = list(datasets)
    pieces = [vector1[d] for d in order] + [vector2[d] for d in order]
    sizes = [int(p.shape[0]) for p in pieces]

    fused_out = mlp_fused_forward(pieces, params)

    # Per-dataset slices index directly into the (possibly row-padded) output;
    # the pad rows sit past the last slice, so no separate strip is needed.
    outs, off = [], 0
    for s in sizes:
        outs.append(fused_out[off:off + s])
        off += s

    n = len(order)
    content = {d: outs[i] for i, d in enumerate(order)}
    domain = {d: outs[n + i] for i, d in enumerate(order)}
    return content, domain


# ----------------------------------------------------------------------------
# Reference (plain JAX) for sanity checking
# ----------------------------------------------------------------------------
def _mlp_ref(x, params):
    w1, b1, w2, b2, w3, b3 = params
    h = jnp.maximum(x @ w1 + b1, 0.0)
    h = jnp.maximum(h @ w2 + b2, 0.0)
    return jnp.maximum(h @ w3 + b3, 0.0)


if __name__ == "__main__":
    in_size = 32     # per-dataset feature vector size
    batch = 8
    datasets = ["d0", "d1"]

    key = jax.random.PRNGKey(0)
    kp, kv = jax.random.split(key)
    params = init_vector_convert_params(kp, in_size)

    # Build the two input dicts {dataset: (batch, in_size)}.
    kvs = jax.random.split(kv, 2 * len(datasets))
    vector1, vector2 = {}, {}
    for i, dset in enumerate(datasets):
        vector1[dset] = jax.random.normal(kvs[2 * i], (batch, in_size), jnp.float32)
        vector2[dset] = jax.random.normal(kvs[2 * i + 1], (batch, in_size), jnp.float32)

    content, domain = vector_convert_forward(params, datasets, vector1, vector2)
    jax.block_until_ready((content, domain))

    # Correctness check against plain-JAX reference (f32 path at this size).
    for dset in datasets:
        ref_c = _mlp_ref(vector1[dset], params)
        ref_d = _mlp_ref(vector2[dset], params)
        assert jnp.allclose(content[dset], ref_c, atol=1e-5, rtol=1e-5)
        assert jnp.allclose(domain[dset], ref_d, atol=1e-5, rtol=1e-5)
        assert content[dset].shape == (batch, in_size)
        assert domain[dset].shape == (batch, in_size)

    print("KERNEL_OK")
</pallas_src>

<mosaic_0001>
module attributes {stable_mosaic.version = 11 : i64} {
  func.func @_mlp_kernel(%arg0: i32, %arg1: memref<32x32xf32, #tpu.memory_space<vmem>>, %arg2: memref<32x128xf32, #tpu.memory_space<vmem>>, %arg3: memref<1x128xf32, #tpu.memory_space<vmem>>, %arg4: memref<128x128xf32, #tpu.memory_space<vmem>>, %arg5: memref<1x128xf32, #tpu.memory_space<vmem>>, %arg6: memref<128x32xf32, #tpu.memory_space<vmem>>, %arg7: memref<1x32xf32, #tpu.memory_space<vmem>>, %arg8: memref<32x32xf32, #tpu.memory_space<vmem>>) attributes {dimension_semantics = [#tpu.dimension_semantics<parallel>], iteration_bounds = array<i64: 1>, scalar_prefetch = 0 : i64, scratch_operands = 0 : i64, tpu.core_type = #tpu.core_type<tc>, window_params = [{transform_indices = @transform_0, window_bounds = array<i64: 32, 32>}, {pipeline_mode = #tpu.pipeline_mode<synchronous>, transform_indices = @transform_1, window_bounds = array<i64: 32, 128>}, {pipeline_mode = #tpu.pipeline_mode<synchronous>, transform_indices = @transform_2, window_bounds = array<i64: 1, 128>}, {pipeline_mode = #tpu.pipeline_mode<synchronous>, transform_indices = @transform_3, window_bounds = array<i64: 128, 128>}, {pipeline_mode = #tpu.pipeline_mode<synchronous>, transform_indices = @transform_4, window_bounds = array<i64: 1, 128>}, {pipeline_mode = #tpu.pipeline_mode<synchronous>, transform_indices = @transform_5, window_bounds = array<i64: 128, 32>}, {pipeline_mode = #tpu.pipeline_mode<synchronous>, transform_indices = @transform_6, window_bounds = array<i64: 1, 32>}, {transform_indices = @transform_7, window_bounds = array<i64: 32, 32>}]} {
    %c0 = arith.constant 0 : index
    %c0_0 = arith.constant 0 : index
    %0 = vector.load %arg1[%c0, %c0_0] : memref<32x32xf32, #tpu.memory_space<vmem>>, vector<32x32xf32>
    %c0_1 = arith.constant 0 : index
    %c0_2 = arith.constant 0 : index
    %1 = vector.load %arg2[%c0_1, %c0_2] : memref<32x128xf32, #tpu.memory_space<vmem>>, vector<32x128xf32>
    %cst = arith.constant dense<0.000000e+00> : vector<32x128xf32>
    %2 = tpu.matmul %0, %1, %cst {dimension_numbers = #tpu.dot_dimension_numbers<[1], [0], [0], [1], [0, 0, 1, 1], [], []>} : vector<32x32xf32>, vector<32x128xf32>, vector<32x128xf32> -> vector<32x128xf32>
    %c0_3 = arith.constant 0 : index
    %c0_4 = arith.constant 0 : index
    %3 = vector.load %arg3[%c0_3, %c0_4] : memref<1x128xf32, #tpu.memory_space<vmem>>, vector<1x128xf32>
    %4 = vector.broadcast %3 : vector<1x128xf32> to vector<32x128xf32>
    %5 = arith.addf %2, %4 : vector<32x128xf32>
    %cst_5 = arith.constant 0.000000e+00 : f32
    %6 = vector.broadcast %cst_5 : f32 to vector<32x128xf32>
    %7 = arith.maximumf %5, %6 : vector<32x128xf32>
    %c0_6 = arith.constant 0 : index
    %c0_7 = arith.constant 0 : index
    %8 = vector.load %arg4[%c0_6, %c0_7] : memref<128x128xf32, #tpu.memory_space<vmem>>, vector<128x128xf32>
    %cst_8 = arith.constant dense<0.000000e+00> : vector<32x128xf32>
    %9 = tpu.matmul %7, %8, %cst_8 {dimension_numbers = #tpu.dot_dimension_numbers<[1], [0], [0], [1], [0, 0, 1, 1], [], []>} : vector<32x128xf32>, vector<128x128xf32>, vector<32x128xf32> -> vector<32x128xf32>
    %c0_9 = arith.constant 0 : index
    %c0_10 = arith.constant 0 : index
    %10 = vector.load %arg5[%c0_9, %c0_10] : memref<1x128xf32, #tpu.memory_space<vmem>>, vector<1x128xf32>
    %11 = vector.broadcast %10 : vector<1x128xf32> to vector<32x128xf32>
    %12 = arith.addf %9, %11 : vector<32x128xf32>
    %cst_11 = arith.constant 0.000000e+00 : f32
    %13 = vector.broadcast %cst_11 : f32 to vector<32x128xf32>
    %14 = arith.maximumf %12, %13 : vector<32x128xf32>
    %c0_12 = arith.constant 0 : index
    %c0_13 = arith.constant 0 : index
    %15 = vector.load %arg6[%c0_12, %c0_13] : memref<128x32xf32, #tpu.memory_space<vmem>>, vector<128x32xf32>
    %cst_14 = arith.constant dense<0.000000e+00> : vector<32x32xf32>
    %16 = tpu.matmul %14, %15, %cst_14 {dimension_numbers = #tpu.dot_dimension_numbers<[1], [0], [0], [1], [0, 0, 1, 1], [], []>} : vector<32x128xf32>, vector<128x32xf32>, vector<32x32xf32> -> vector<32x32xf32>
    %c0_15 = arith.constant 0 : index
    %c0_16 = arith.constant 0 : index
    %17 = vector.load %arg7[%c0_15, %c0_16] : memref<1x32xf32, #tpu.memory_space<vmem>>, vector<1x32xf32>
    %18 = vector.broadcast %17 : vector<1x32xf32> to vector<32x32xf32>
    %19 = arith.addf %16, %18 : vector<32x32xf32>
    %cst_17 = arith.constant 0.000000e+00 : f32
    %20 = vector.broadcast %cst_17 : f32 to vector<32x32xf32>
    %21 = arith.maximumf %19, %20 : vector<32x32xf32>
    %c0_18 = arith.constant 0 : index
    %c0_19 = arith.constant 0 : index
    %22 = vector.load %arg8[%c0_18, %c0_19] : memref<32x32xf32, #tpu.memory_space<vmem>>, vector<32x32xf32>
    tpu.vector_store %arg8[%c0_18, %c0_19], %21 {strides = array<i32>} : memref<32x32xf32, #tpu.memory_space<vmem>>, vector<32x32xf32>,
    return
  }
  func.func @transform_0(%arg0: i32) -> (i32, i32) {
    %c0_i32 = arith.constant 0 : i32
    %c0_i32_0 = arith.constant 0 : i32
    return %arg0, %c0_i32 : i32, i32
  }
  func.func @transform_1(%arg0: i32) -> (i32, i32) {
    %c0_i32 = arith.constant 0 : i32
    %c0_i32_0 = arith.constant 0 : i32
    %c0_i32_1 = arith.constant 0 : i32
    return %c0_i32, %c0_i32_0 : i32, i32
  }
  func.func @transform_2(%arg0: i32) -> (i32, i32) {
    %c0_i32 = arith.constant 0 : i32
    %c0_i32_0 = arith.constant 0 : i32
    %c0_i32_1 = arith.constant 0 : i32
    return %c0_i32, %c0_i32_0 : i32, i32
  }
  func.func @transform_3(%arg0: i32) -> (i32, i32) {
    %c0_i32 = arith.constant 0 : i32
    %c0_i32_0 = arith.constant 0 : i32
    %c0_i32_1 = arith.constant 0 : i32
    return %c0_i32, %c0_i32_0 : i32, i32
  }
  func.func @transform_4(%arg0: i32) -> (i32, i32) {
    %c0_i32 = arith.constant 0 : i32
    %c0_i32_0 = arith.constant 0 : i32
    %c0_i32_1 = arith.constant 0 : i32
    return %c0_i32, %c0_i32_0 : i32, i32
  }
  func.func @transform_5(%arg0: i32) -> (i32, i32) {
    %c0_i32 = arith.constant 0 : i32
    %c0_i32_0 = arith.constant 0 : i32
    %c0_i32_1 = arith.constant 0 : i32
    return %c0_i32, %c0_i32_0 : i32, i32
  }
  func.func @transform_6(%arg0: i32) -> (i32, i32) {
    %c0_i32 = arith.constant 0 : i32
    %c0_i32_0 = arith.constant 0 : i32
    %c0_i32_1 = arith.constant 0 : i32
    return %c0_i32, %c0_i32_0 : i32, i32
  }
  func.func @transform_7(%arg0: i32) -> (i32, i32) {
    %c0_i32 = arith.constant 0 : i32
    %c0_i32_0 = arith.constant 0 : i32
    return %arg0, %c0_i32 : i32, i32
  }
}

</mosaic_0001>

<bundles_post_ra>
// kernel: tpu_custom_call.1
= control target key start
LH: loop header
LB: loop body
LE: loop exit
PB: predicated region body
PF: predicated region fallthrough
CT: control target
= control target key end

     0   :  { %12 = vsyncpa [#allocation3], 0  ;;  %s871_s0 = inlined_call_operand.vmem [shape: f32[32,32], index: 0, kind: input, shape index: {}]   ;;  %s872_s1 = inlined_call_operand.hbm [shape: f32[32,128], index: 1, kind: input, shape index: {}]   ;;  %s873_s2 = inlined_call_operand.vmem [shape: f32[1,128], index: 2, kind: input, shape index: {}]   ;;  %s874_s3 = inlined_call_operand.vmem [shape: f32[128,128], index: 3, kind: input, shape index: {}]   ;;  %s875_s4 = inlined_call_operand.vmem [shape: f32[1,128], index: 4, kind: input, shape index: {}]   ;;  %s876_s5 = inlined_call_operand.vmem [shape: f32[128,32], index: 5, kind: input, shape index: {}]   ;;  %s877_s6 = inlined_call_operand.vmem [shape: f32[1,32], index: 6, kind: input, shape index: {}]   ;;  %s878_s7 = inlined_call_operand.hbm [shape: f32[32,32], index: 7, kind: output, shape index: {}]  }
   0x1   :  { %13 = vsyncpa [#allocation4], 0  ;;  %s672_s24 = smov [#allocation2]   ;;  %s624_s28 = scalar_lea.hbm %s872_s1, 512 }
   0x2   :  { %s21_s25 = sshll.u32 %s672_s24, 4  ;;  %p625_p0 = scmp.ne.s32.totalorder %s872_s1, %s624_s28  ;;  %s22_s25 = int_to_ptr.vmem [resolvable:$true] %s21_s25 }
   0x3   :  { %p628_p1 = scmp.lt.u32.totalorder %s624_s28, %s872_s1 }
   0x5   :  { %p630_p2 = pnand %p628_p1, %p625_p0 }
   0x7   :  { %633 = shalt.err (!%p630_p2)
}
   0x8   :  { %s634_s10 = scalar_lea.vmem %s22_s25, 512  ;;  %p639_p4 = scmp.lt.s32.totalorder %s22_s25, %s22_s25 }
   0x9   :  { %p635_p3 = scmp.ne.s32.totalorder %s22_s25, %s634_s10  ;;  %p640_p5 = scmp.lt.s32.totalorder %s634_s10, %s634_s10 }
   0xb   :  { %p641_p6 = por %p640_p5, %p639_p4 }
   0xd   :  { %p642_p7 = pnand %p641_p6, %p635_p3 }
   0xf   :  { %645 = shalt.err (!%p642_p7)
}
  0x10   :  { %s673_s11 = smov 128   ;;  %s674_s12 = smov 8  }
  0x11   :  { %27 = dma.hbm_to_vmem [thread:$0]  %s872_s1, 512, %s22_s25, [#allocation3], %s673_s11, %s673_s11, %s674_s12  }
  0x12   :  { %668 = dma.done.wait [#allocation3], 512  }
  0x13   :  { %669 = vsyncadd [#allocation3], 4294966784  ;;  %vm56_vm0 = vcmask 261120   ;;  %v45_v0 = vld [vmem:[#allocation2] sm:$0xff]  ;;  %v46_v1 = vld [vmem:[#allocation2 + $0x8] sm:$0xff] }
  0x14   :  { %v47_v2 = vld [vmem:[#allocation2 + $0x10] sm:$0xff]  ;;  %v548_v3 = vpack.c.bf16 %v46_v1, %v45_v0  ;;  %v48_v4 = vld [vmem:[#allocation2 + $0x18] sm:$0xff]  ;;  %v41_v5 = vld [vmem:[%s871_s0] sm:$0xff] }
  0x15   :  { %v552_v6 = vpack.c.bf16 %v48_v4, %v47_v2  ;;  %466 = vmatprep.mubr.msk.f32.mxu0 %vm56_vm0, %v41_v5  ;;  %v158_v7 = vld [vmem:[%s874_s3] sm:$0xff]  ;;  %v159_v8 = vld [vmem:[%s874_s3 + $0x8] sm:$0xff]  ;;  %v160_v9 = vld [vmem:[%s874_s3 + $0x10] sm:$0xff] }
  0x16   :  { %549 = vmatprep.subr.bf16.mxu0 %v548_v3  ;;  %v161_v10 = vld [vmem:[%s874_s3 + $0x18] sm:$0xff]  ;;  %v556_v11 = vpack.c.bf16 %v159_v8, %v158_v7  ;;  %v162_v13 = vld [vmem:[%s874_s3 + $0x20] sm:$0xff]  ;;  %v163_v14 = vld [vmem:[%s874_s3 + $0x28] sm:$0xff] }
  0x17   :  { %551 = vmatpush3.bf16.msra.mxu0 %v548_v3  ;;  %v560_v12 = vpack.c.bf16 %v161_v10, %v160_v9  ;;  %v42_v15 = vld [vmem:[%s871_s0 + $0x8] sm:$0xff]  ;;  %v564_v16 = vpack.c.bf16 %v163_v14, %v162_v13  ;;  %v43_v17 = vld [vmem:[%s871_s0 + $0x10] sm:$0xff]  ;;  %v165_v19 = vld [vmem:[%s874_s3 + $0x38] sm:$0xff] }
  0x18   :  { %553 = vmatprep.subr.bf16.mxu0 %v552_v6  ;;  %557 = vmatprep.subr.bf16.mxu1 %v556_v11  ;;  %v164_v18 = vld [vmem:[%s874_s3 + $0x30] sm:$0xff]  ;;  %v44_v20 = vld [vmem:[%s871_s0 + $0x18] sm:$0xff]  ;;  %v166_v22 = vld [vmem:[%s874_s3 + $0x40] sm:$0xff] }
  0x19   :  { %559 = vmatpush3.bf16.msra.mxu1 %v556_v11  ;;  %v568_v21 = vpack.c.bf16 %v165_v19, %v164_v18  ;;  %v167_v23 = vld [vmem:[%s874_s3 + $0x48] sm:$0xff]  ;;  %v168_v25 = vld [vmem:[%s874_s3 + $0x50] sm:$0xff]  ;;  %v169_v26 = vld [vmem:[%s874_s3 + $0x58] sm:$0xff] }
  0x1a   :  { %561 = vmatprep.subr.bf16.mxu1 %v560_v12  ;;  %v572_v24 = vpack.c.bf16 %v167_v23, %v166_v22  ;;  %v576_v27 = vpack.c.bf16 %v169_v26, %v168_v25  ;;  %v170_v28 = vld [vmem:[%s874_s3 + $0x60] sm:$0xff]  ;;  %v171_v29 = vld [vmem:[%s874_s3 + $0x68] sm:$0xff]  ;;  %v172_v31 = vld [vmem:[%s874_s3 + $0x70] sm:$0xff] }
  0x1b   :  { %555 = vmatpush3.bf16.msra.mxu0 %v552_v6  ;;  %v580_v30 = vpack.c.bf16 %v171_v29, %v170_v28  ;;  %v173_v32 = vld [vmem:[%s874_s3 + $0x78] sm:$0xff]  ;;  %v270_v34 = vld [vmem:[%s876_s5] sm:$0xff]  ;;  %v271_v35 = vld [vmem:[%s876_s5 + $0x8] sm:$0xff] }
  0x1c   :  { %v584_v33 = vpack.c.bf16 %v173_v32, %v172_v31  ;;  %v272_v36 = vld [vmem:[%s876_s5 + $0x10] sm:$0xff]  ;;  %v588_v37 = vpack.c.bf16 %v271_v35, %v270_v34  ;;  %v273_v38 = vld [vmem:[%s876_s5 + $0x18] sm:$0xff]  ;;  %v274_v40 = vld [vmem:[%s876_s5 + $0x20] sm:$0xff] }
  0x1d   :  { %563 = vmatpush3.bf16.msra.mxu1 %v560_v12  ;;  %v592_v39 = vpack.c.bf16 %v273_v38, %v272_v36  ;;  %v275_v41 = vld [vmem:[%s876_s5 + $0x28] sm:$0xff]  ;;  %v276_v43 = vld [vmem:[%s876_s5 + $0x30] sm:$0xff]  ;;  %v277_v44 = vld [vmem:[%s876_s5 + $0x38] sm:$0xff] }
  0x1e   :  { %467 = vmatmul.mubr.msk.f32.vlgmr.msra.gmra.mrb[0].mxu0 %vm56_vm0, %v42_v15  ;;  %565 = vmatprep.subr.bf16.mxu1 %v564_v16  ;;  %v596_v42 = vpack.c.bf16 %v275_v41, %v274_v40  ;;  %v600_v45 = vpack.c.bf16 %v277_v44, %v276_v43  ;;  %v278_v46 = vld [vmem:[%s876_s5 + $0x40] sm:$0xff]  ;;  %v279_v47 = vld [vmem:[%s876_s5 + $0x48] sm:$0xff]  ;;  %v280_v49 = vld [vmem:[%s876_s5 + $0x50] sm:$0xff] }
  0x1f   :  { %469 = vmatprep.mubr.msk.f32.mxu0 %vm56_vm0, %v43_v17  ;;  %589 = vmatprep.subr.bf16.mxu0 %v588_v37  ;;  %v604_v48 = vpack.c.bf16 %v279_v47, %v278_v46  ;;  %v281_v50 = vld [vmem:[%s876_s5 + $0x58] sm:$0xff]  ;;  %v282_v52 = vld [vmem:[%s876_s5 + $0x60] sm:$0xff]  ;;  %v283_v53 = vld [vmem:[%s876_s5 + $0x68] sm:$0xff] }
  0x20   :  { %591 = vmatpush3.bf16.msra.mxu0 %v588_v37  ;;  %v608_v51 = vpack.c.bf16 %v281_v50, %v280_v49  ;;  %v612_v54 = vpack.c.bf16 %v283_v53, %v282_v52  ;;  %v403_v55 = vld [vmem:[%s873_s2] ss:$0 sm:$0xff]  ;;  %v284_v4 = vld [vmem:[%s876_s5 + $0x70] sm:$0xff]  ;;  %v285_v5 = vld [vmem:[%s876_s5 + $0x78] sm:$0xff] }
  0x21   :  { %567 = vmatpush3.bf16.msra.mxu1 %v564_v16  ;;  %593 = vmatprep.subr.bf16.mxu0 %v592_v39  ;;  %v616_v6 = vpack.c.bf16 %v285_v5, %v284_v4  ;;  %v408_v7 = vld [vmem:[%s875_s4] ss:$0 sm:$0xff]  ;;  %s675_s4 = smov [#allocation5]  }
  0x22   :  { %470 = vmatmul.mubr.msk.f32.gmra.mrb[2].mxu0 %vm56_vm0, %v44_v20  ;;  %569 = vmatprep.subr.bf16.mxu1 %v568_v21  ;;  %v409_v20 = vld [vmem:[%s877_s6] ss:$0 sm:$0xff]  ;;  %s391_s20 = sshll.u32 %s675_s4, 4  ;;  %s392_s20 = int_to_ptr.vmem [resolvable:$true] %s391_s20 }
  0x23   :  { %s646_s6 = scalar_lea.vmem %s392_s20, 512  ;;  %p651_p9 = scmp.lt.s32.totalorder %s392_s20, %s392_s20 }
  0x24   :  { %595 = vmatpush3.bf16.msra.mxu0 %v592_v39  ;;  %p647_p8 = scmp.ne.s32.totalorder %s392_s20, %s646_s6  ;;  %p652_p10 = scmp.lt.s32.totalorder %s646_s6, %s646_s6 }
  0x25   :  { %571 = vmatpush3.bf16.msra.mxu1 %v568_v21  ;;  %597 = vmatprep.subr.bf16.mxu0 %v596_v42 }
  0x26   :  { %573 = vmatprep.subr.bf16.mxu1 %v572_v24  ;;  %p653_p11 = por %p652_p10, %p651_p9 }
  0x28   :  { %599 = vmatpush3.bf16.msra.mxu0 %v596_v42  ;;  %p654_p12 = pnand %p653_p11, %p647_p8 }
  0x29   :  { %575 = vmatpush3.bf16.msra.mxu1 %v572_v24  ;;  %601 = vmatprep.subr.bf16.mxu0 %v600_v45 }
  0x2a   :  { %577 = vmatprep.subr.bf16.mxu1 %v576_v27 }
  0x2c   :  { %603 = vmatpush3.bf16.msra.mxu0 %v600_v45 }
  0x2d   :  { %579 = vmatpush3.bf16.msra.mxu1 %v576_v27  ;;  %605 = vmatprep.subr.bf16.mxu0 %v604_v48 }
  0x2e   :  { %581 = vmatprep.subr.bf16.mxu1 %v580_v30 }
  0x30   :  { %607 = vmatpush3.bf16.msra.mxu0 %v604_v48 }
  0x31   :  { %583 = vmatpush3.bf16.msra.mxu1 %v580_v30  ;;  %609 = vmatprep.subr.bf16.mxu0 %v608_v51 }
  0x32   :  { %585 = vmatprep.subr.bf16.mxu1 %v584_v33 }
  0x34   :  { %611 = vmatpush3.bf16.msra.mxu0 %v608_v51 }
  0x35   :  { %587 = vmatpush3.bf16.msra.mxu1 %v584_v33  ;;  %613 = vmatprep.subr.bf16.mxu0 %v612_v54 }
  0x38   :  { %615 = vmatpush3.bf16.msra.mxu0 %v612_v54 }
  0x39   :  { %617 = vmatprep.subr.bf16.mxu0 %v616_v6 }
  0x3c   :  { %619 = vmatpush3.bf16.msra.mxu0 %v616_v6 }
  0xf1   :  { %v468_v56 = vpop.f32.mrb[0].mxu0 }
  0xf2   :  { %v141_v57 = vadd.f32 %v468_v56, %v403_v55  ;;  %v135_v58 = vpop.f32.mrb[1].mxu0 }
  0xf3   :  { %v136_v59 = vadd.f32 %v403_v55, %v135_v58 }
  0xf4   :  { %v155_v62 = vmax.f32 %v141_v57, 0.0 }
  0xf5   :  { %v471_v60 = vpop.f32.mrb[2].mxu0  ;;  %v154_v61 = vmax.f32 %v136_v59, 0.0 }
  0xf6   :  { %v151_v63 = vadd.f32 %v471_v60, %v403_v55  ;;  %v145_v0 = vpop.f32.mrb[3].mxu0 }
  0xf7   :  { %v146_v1 = vadd.f32 %v403_v55, %v145_v0  ;;  %504 = vmatprep.mubr.f32.mxu1 %v154_v61 }
  0xf8   :  { %505 = vmatmul.mubr.f32.vlgmr.msra.gmra.mrb[0].mxu1 %v155_v62  ;;  %v157_v3 = vmax.f32 %v151_v63, 0.0 }
  0xf9   :  { %v156_v2 = vmax.f32 %v146_v1, 0.0 }
  0xfb   :  { %507 = vmatprep.mubr.f32.mxu1 %v156_v2 }
  0xfc   :  { %508 = vmatmul.mubr.f32.gmra.mrb[2].mxu1 %v157_v3 }
 0x1cb   :  { %v506_v8 = vpop.f32.mrb[0].mxu1 }
 0x1cc   :  { %v253_v9 = vadd.f32 %v506_v8, %v408_v7  ;;  %v247_v10 = vpop.f32.mrb[1].mxu1 }
 0x1cd   :  { %v248_v11 = vadd.f32 %v408_v7, %v247_v10 }
 0x1ce   :  { %v267_v14 = vmax.f32 %v253_v9, 0.0 }
 0x1cf   :  { %v266_v12 = vmax.f32 %v248_v11, 0.0  ;;  %v509_v13 = vpop.f32.mrb[2].mxu1 }
 0x1d0   :  { %v263_v15 = vadd.f32 %v509_v13, %v408_v7  ;;  %v257_v16 = vpop.f32.mrb[3].mxu1 }
 0x1d1   :  { %v258_v17 = vadd.f32 %v408_v7, %v257_v16  ;;  %542 = vmatprep.mubr.f32.mxu0 %v266_v12 }
 0x1d2   :  { %543 = vmatmul.mubr.f32.vlgmr.msra.gmra.mrb[4].mxu0 %v267_v14  ;;  %v269_v19 = vmax.f32 %v263_v15, 0.0 }
 0x1d3   :  { %v268_v18 = vmax.f32 %v258_v17, 0.0 }
 0x1d5   :  { %545 = vmatprep.mubr.f32.mxu0 %v268_v18 }
 0x1d6   :  { %546 = vmatmul.mubr.f32.gmra.mrb[6].mxu0 %v269_v19 }
 0x2a5   :  { %v544_v21 = vpop.f32.mrb[4].mxu0 }
 0x2a6   :  { %v365_v22 = vadd.f32 %v544_v21, %v409_v20  ;;  %v359_v23 = vpop.f32.mrb[5].mxu0 }
 0x2a7   :  { %v360_v24 = vadd.f32 %v409_v20, %v359_v23 }
 0x2a8   :  { %v379_v25 = vmax.f32 %v365_v22, 0.0 }
 0x2a9   :  { %v378_v26 = vmax.f32 %v360_v24, 0.0  ;;  %v547_v27 = vpop.f32.mrb[6].mxu0 }
 0x2aa   :  { %383 = vst.msk [vmem:[#allocation5 + $0x8] sm:$0xff] %vm56_vm0, %v379_v25  ;;  %v375_v28 = vadd.f32 %v547_v27, %v409_v20  ;;  %v369_v29 = vpop.f32.mrb[7].mxu0 }
 0x2ab   :  { %382 = vst.msk [vmem:[#allocation5] sm:$0xff] %vm56_vm0, %v378_v26  ;;  %v370_v30 = vadd.f32 %v409_v20, %v369_v29 }
 0x2ac   :  { %v381_v31 = vmax.f32 %v375_v28, 0.0 }
 0x2ad   :  { %v380_v32 = vmax.f32 %v370_v30, 0.0 }
 0x2ae   :  { %385 = vst.msk [vmem:[#allocation5 + $0x18] sm:$0xff] %vm56_vm0, %v381_v31 }
 0x2af   :  { %384 = vst.msk [vmem:[#allocation5 + $0x10] sm:$0xff] %vm56_vm0, %v380_v32 }
 0x2b0   :  { %657 = shalt.err (!%p654_p12)
}
 0x2b1   :  { %s658_s22 = scalar_lea.hbm %s878_s7, 512 }
 0x2b2   :  { %p659_p13 = scmp.ne.s32.totalorder %s878_s7, %s658_s22  ;;  %p662_p0 = scmp.lt.u32.totalorder %s658_s22, %s878_s7 }
 0x2b4   :  { %p664_p1 = pnand %p662_p0, %p659_p13 }
 0x2b6   :  { %667 = shalt.err (!%p664_p1)
}
 0x2b7   :  { %397 = dma.vmem_to_hbm [thread:$0]  %s392_s20, 512, %s878_s7, [#allocation4], %s673_s11, %s673_s11, %s674_s12  }
 0x2b8   :  { %670 = dma.done.wait [#allocation4], 512  }
 0x2b9   :  { %671 = vsyncadd [#allocation4], 4294966784 }
 0x2ba   :  { %401 = vsyncpa [#allocation3], 1 }
 0x2bb   :  { %402 = vsyncpa [#allocation4], 1 }

</bundles_post_ra>
